<compile_context>
chip_gen: v6e
topology: v6e:2x2x1
jax: 0.10.0
libtpu: 0.0.40
codegen_flags: <defaults>
</compile_context>

<pallas_src>
import jax
import jax.numpy as jnp
from jax.experimental import pallas as pl
from jax.experimental.pallas import tpu as pltpu


def _crelu_kernel(bias_ref, x_ref, o_ref):
    # bias_ref: (1,) scalar in SMEM; x_ref / o_ref: tile in VMEM (2-D or 1-D).
    b = bias_ref[0]
    x = x_ref[...]
    # Matches torch: x * (x >= b).float()  (propagates NaN / signed inf exactly)
    o_ref[...] = x * (x >= b).astype(x.dtype)


def _choose_lane_width(total: int):
    # Largest multiple of 128 that exactly divides total -> dense, unpadded
    # (rows, lane) layout with unmasked vector stores. None if nothing fits.
    for lane in (8192, 4096, 2048, 1024, 512, 256, 128):
        if lane <= total and total % lane == 0:
            return lane
    return None


def _device_kind() -> str:
    try:
        return jax.devices()[0].device_kind.lower()
    except Exception:
        return ""


def crelu(x: jax.Array, bias, *, target_tile_bytes: int | None = None,
          donate_x: bool = False) -> jax.Array:
    """cReLU: x * (x >= bias). `bias` may be a python float, 0-d or (1,) array."""
    orig_shape = x.shape
    total = x.size
    dtype = x.dtype
    itemsize = jnp.dtype(dtype).itemsize
    total_bytes = total * itemsize

    # Normalize bias to a (1,) array in x's dtype (handles float / 0-d / (1,)).
    bias1 = jnp.asarray(bias, dtype=dtype).reshape(1)

    kind = _device_kind()
    is_v5e = ("v5e" in kind) or ("v5 lite" in kind) or ("v5litepod" in kind)
    is_v7x = ("v7" in kind) or ("7x" in kind)
    if target_tile_bytes is None:
        # ~4 MiB on v5e (16 MiB default scoped VMEM), ~8 MiB on v6e / v7x.
        target_tile_bytes = (4 << 20) if is_v5e else (8 << 20)

    # Sublane packing factor: 8 for f32, 16 for bf16, 32 for int8/fp8.
    sub = max(8, 32 // itemsize)

    lane = _choose_lane_width(total)
    if lane is not None:
        # ---- Lane-dense 2-D path (no padding, no slicing). ----
        rows = total // lane
        x_in = x.reshape(rows, lane)
        tile_rows = max(1, target_tile_bytes // (lane * itemsize))
        if tile_rows >= rows:
            tm = rows  # single block; block == full dim is always legal
        else:
            tm = max(sub, (tile_rows // sub) * sub)
            # Guarantee >= 4 grid steps (when >= ~2 tiles of data) so the
            # BlockSpec pipeline has something to overlap.
            if total_bytes >= 2 * target_tile_bytes:
                max_tm = pl.cdiv(rows, 4)
                max_tm = max(sub, (max_tm // sub) * sub)
                tm = min(tm, max_tm)
            tm = max(1, min(tm, rows))
        grid = (pl.cdiv(rows, tm),)
        in_block = pl.BlockSpec((tm, lane), lambda i: (i, 0))
        out_block = pl.BlockSpec((tm, lane), lambda i: (i, 0))
        out_shape = jax.ShapeDtypeStruct((rows, lane), dtype)
        tile_bytes = tm * lane * itemsize
    else:
        # ---- Fallback (total % 128 != 0): flat 1-D, Pallas masks the partial
        # edge block. Still no pad / slice copies. ----
        x_in = x.reshape(-1)
        tl = max(128, (target_tile_bytes // itemsize // 128) * 128)
        if tl >= total:
            tl = total  # single block covering the whole (small) array
        elif pl.cdiv(total, tl) < 4 and total > 2 * tl:
            tl = max(128, ((pl.cdiv(total, 4) + 127) // 128) * 128)
        grid = (pl.cdiv(total, tl),)
        in_block = pl.BlockSpec((tl,), lambda i: (i,))
        out_block = pl.BlockSpec((tl,), lambda i: (i,))
        out_shape = jax.ShapeDtypeStruct((total,), dtype)
        tile_bytes = tl * itemsize

    # Right-sized VMEM budget: double-buffered in+out (~4x tile) + slack,
    # never the full 64 MiB of a v7x TensorCore.
    vmem_limit = int(min(40 << 20, max(16 << 20, 4 * tile_bytes + (8 << 20))))

    # On v7x, split the row axis across both TensorCores; elsewhere (or if
    # CORE_PARALLEL is rejected) fall back to plain "parallel".
    semantics_candidates = []
    if is_v7x and grid[0] >= 2 and hasattr(pltpu, "CORE_PARALLEL"):
        semantics_candidates.append((pltpu.CORE_PARALLEL,))
    semantics_candidates.append(("parallel",))

    out = None
    last_err = None
    for sem in semantics_candidates:
        try:
            out = pl.pallas_call(
                _crelu_kernel,
                out_shape=out_shape,
                grid=grid,
                in_specs=[
                    pl.BlockSpec(memory_space=pltpu.MemorySpace.SMEM),  # bias
                    in_block,                                           # x tile
                ],
                out_specs=out_block,
                compiler_params=pltpu.CompilerParams(
                    dimension_semantics=sem,
                    vmem_limit_bytes=vmem_limit,
                ),
                # Optional destructive reuse of x's HBM buffer (saves the
                # output allocation, not bandwidth).
                input_output_aliases=({1: 0} if donate_x else {}),
            )(bias1, x_in)
            last_err = None
            break
        except Exception as e:  # CORE_PARALLEL fallback path
            last_err = e
            out = None
    if out is None:
        raise last_err

    return out.reshape(orig_shape)


def crelu_ref(x, bias):
    b = jnp.asarray(bias, dtype=x.dtype).reshape((1,) * x.ndim)
    return x * (x >= b).astype(x.dtype)


if __name__ == "__main__":
    key = jax.random.PRNGKey(0)
    # Deterministic parameter init, matching __init__(bias=0.7).
    bias = jnp.array([0.7], dtype=jnp.float32)

    # Small NCHW inputs consistent with the module's conv-activation usage.
    shapes = [
        (2, 4, 16, 16),  # total % 128 == 0 -> lane-dense 2-D path
        (2, 3, 5, 7),    # unaligned total  -> flat masked-edge fallback path
    ]
    for i, shp in enumerate(shapes):
        k = jax.random.fold_in(key, i)
        x = jax.random.normal(k, shp, dtype=jnp.float32)
        out = jax.block_until_ready(crelu(x, bias))
        expected = crelu_ref(x, bias)
        assert out.shape == x.shape
        assert out.dtype == x.dtype
        assert jnp.allclose(out, expected, atol=1e-6), f"mismatch vs reference for {shp}"

    print("KERNEL_OK")
</pallas_src>

<mosaic_0001>
module attributes {stable_mosaic.version = 11 : i64} {
  func.func @_crelu_kernel(%arg0: i32, %arg1: memref<1xf32, #tpu.memory_space<smem>>, %arg2: memref<1x2048xf32, #tpu.memory_space<vmem>>, %arg3: memref<1x2048xf32, #tpu.memory_space<vmem>>) attributes {dimension_semantics = [#tpu.dimension_semantics<parallel>], iteration_bounds = array<i64: 1>, scalar_prefetch = 0 : i64, scratch_operands = 0 : i64, tpu.core_type = #tpu.core_type<tc>, window_params = [{transform_indices = @transform_0, window_bounds = array<i64: 1>}, {transform_indices = @transform_1, window_bounds = array<i64: 1, 2048>}, {transform_indices = @transform_2, window_bounds = array<i64: 1, 2048>}]} {
    %c0 = arith.constant 0 : index
    %0 = memref.load %arg1[%c0] : memref<1xf32, #tpu.memory_space<smem>>
    %c0_0 = arith.constant 0 : index
    %c0_1 = arith.constant 0 : index
    %1 = vector.load %arg2[%c0_0, %c0_1] : memref<1x2048xf32, #tpu.memory_space<vmem>>, vector<1x2048xf32>
    %2 = vector.broadcast %0 : f32 to vector<1x2048xf32>
    %3 = arith.cmpf oge, %1, %2 : vector<1x2048xf32>
    %4 = arith.extui %3 : vector<1x2048xi1> to vector<1x2048xi32>
    %5 = arith.sitofp %4 : vector<1x2048xi32> to vector<1x2048xf32>
    %6 = arith.mulf %1, %5 : vector<1x2048xf32>
    %c0_2 = arith.constant 0 : index
    %c0_3 = arith.constant 0 : index
    %7 = vector.load %arg3[%c0_2, %c0_3] : memref<1x2048xf32, #tpu.memory_space<vmem>>, vector<1x2048xf32>
    tpu.vector_store %arg3[%c0_2, %c0_3], %6 {strides = array<i32>} : memref<1x2048xf32, #tpu.memory_space<vmem>>, vector<1x2048xf32>,
    return
  }
  func.func @transform_0(%arg0: i32) -> i32 {
    %c0_i32 = arith.constant 0 : i32
    %c0_i32_0 = arith.constant 0 : i32
    return %c0_i32 : i32
  }
  func.func @transform_1(%arg0: i32) -> (i32, i32) {
    %c0_i32 = arith.constant 0 : i32
    %c0_i32_0 = arith.constant 0 : i32
    return %arg0, %c0_i32 : i32, i32
  }
  func.func @transform_2(%arg0: i32) -> (i32, i32) {
    %c0_i32 = arith.constant 0 : i32
    %c0_i32_0 = arith.constant 0 : i32
    return %arg0, %c0_i32 : i32, i32
  }
}

</mosaic_0001>

<bundles_post_ra>
// kernel: tpu_custom_call.1
= control target key start
LH: loop header
LB: loop body
LE: loop exit
PB: predicated region body
PF: predicated region fallthrough
CT: control target
= control target key end

     0   :  { %8 = vsyncpa [#allocation4], 0  ;;  %s130_s0 = inlined_call_operand.<no memory space> [shape: f32[1], index: 0, kind: input, shape index: {}]   ;;  %s131_s1 = inlined_call_operand.hbm [shape: f32[1,2048], index: 1, kind: input, shape index: {}]   ;;  %s132_s2 = inlined_call_operand.hbm [shape: f32[1,2048], index: 2, kind: output, shape index: {}]  }
   0x1   :  { %9 = vsyncpa [#allocation5], 0  ;;  %s103_s9 = smov [#allocation3]  }
   0x2   :  { %s18_s10 = sshll.u32 %s103_s9, 4  ;;  %s19_s10 = int_to_ptr.vmem [resolvable:$true] %s18_s10 }
   0x3   :  { %s67_s11 = scalar_lea.vmem %s19_s10, 256  ;;  %p72_p1 = scmp.lt.s32.totalorder %s19_s10, %s19_s10 }
   0x4   :  { %p68_p0 = scmp.ne.s32.totalorder %s19_s10, %s67_s11  ;;  %p73_p2 = scmp.lt.s32.totalorder %s67_s11, %s67_s11 }
   0x6   :  { %p74_p3 = por %p73_p2, %p72_p1 }
   0x8   :  { %p75_p4 = pnand %p74_p3, %p68_p0 }
   0xa   :  { %78 = shalt.err (!%p75_p4)
}
   0xb   :  { %21 = dma.hbm_to_vmem [thread:$0]  %s131_s1, 256, %s19_s10, [#allocation4]  }
   0xc   :  { %99 = dma.done.wait [#allocation4], 256  }
   0xd   :  { %100 = vsyncadd [#allocation4], 4294967040  ;;  %v28_v0 = vstv %s130_s0  ;;  %v26_v1 = vld [vmem:[#allocation3] sm:$0xff]  ;;  %v27_v2 = vld [vmem:[#allocation3 + $0x8] sm:$0xff]  ;;  %s104_s16 = smov [#allocation6]   ;;  %v105_v3 = vmov 0.0  }
   0xe   :  { %s45_s17 = sshll.u32 %s104_s16, 4  ;;  %vm29_vm0 = vcmp.ge.f32.partialorder %v26_v1, %v28_v0  ;;  %vm30_vm1 = vcmp.ge.f32.partialorder %v27_v2, %v28_v0  ;;  %s46_s17 = int_to_ptr.vmem [resolvable:$true] %s45_s17 }
   0xf   :  { %v54_v4 = vsel %vm29_vm0, 1.0, %v105_v3  ;;  %v55_v5 = vsel %vm30_vm1, 1.0, %v105_v3  ;;  %s79_s1 = scalar_lea.vmem %s46_s17, 256  ;;  %p84_p6 = scmp.lt.s32.totalorder %s46_s17, %s46_s17 }
  0x10   :  { %v35_v6 = vmul.f32 %v54_v4, %v26_v1  ;;  %v36_v7 = vmul.f32 %v55_v5, %v27_v2  ;;  %p80_p5 = scmp.ne.s32.totalorder %s46_s17, %s79_s1  ;;  %p85_p7 = scmp.lt.s32.totalorder %s79_s1, %s79_s1 }
  0x12   :  { %37 = vst [vmem:[#allocation6] sm:$0xff] %v35_v6  ;;  %38 = vst [vmem:[#allocation6 + $0x8] sm:$0xff] %v36_v7  ;;  %p86_p8 = por %p85_p7, %p84_p6 }
  0x14   :  { %p87_p9 = pnand %p86_p8, %p80_p5 }
  0x16   :  { %90 = shalt.err (!%p87_p9)
}
  0x17   :  { %48 = dma.vmem_to_hbm [thread:$0]  %s46_s17, 256, %s132_s2, [#allocation5]  }
  0x18   :  { %101 = dma.done.wait [#allocation5], 256  }
  0x19   :  { %102 = vsyncadd [#allocation5], 4294967040 }
  0x1a   :  { %52 = vsyncpa [#allocation4], 1 }
  0x1b   :  { %53 = vsyncpa [#allocation5], 1 }

</bundles_post_ra>
